<compile_context>
chip_gen: v7x
topology: tpu7x:2x2x1
jax: 0.10.0
libtpu: 0.0.40
codegen_flags: <defaults>
</compile_context>

<pallas_src>
import jax
import jax.numpy as jnp
import numpy as np
from jax.experimental import pallas as pl
from jax.experimental.pallas import tpu as pltpu

POOL = 4            # POOLER_RESOLUTION
REP = 32            # MLP_HEAD_DIM (feature_extractor.out_channels)
NUM_CLASSES = 8     # ROI_BOX_HEAD.NUM_CLASSES (small synthetic value)
IMG = 64            # image size in pixels -> spatial_scale = FEAT / IMG
LANE = 128          # TPU lane width


def _round_up(x, m):
    return (x + m - 1) // m * m


def _vmem_capacity_bytes():
    try:
        return int(pltpu.get_tpu_info().vmem_capacity_bytes)
    except Exception:
        return 64 << 20        # conservative default = v7x per-TC VMEM


def _box_head_kernel_packed(x_ref, w6_ref, b6_ref, w7_ref, b7_ref, wh_ref, bh_ref,
                            out_ref):
    """rep < 128: one lane-dense slab [feat | cls | bbox | 0] (single unmasked store)."""
    cdt = w6_ref.dtype
    x = x_ref[...].astype(cdt)          # in-kernel VPU cast; no wrapper HBM round trip
    h = jnp.dot(x, w6_ref[...], preferred_element_type=jnp.float32) + b6_ref[...]
    h = jnp.maximum(h, 0.0).astype(cdt)
    h = jnp.dot(h, w7_ref[...], preferred_element_type=jnp.float32) + b7_ref[...]
    h = jnp.maximum(h, 0.0).astype(cdt)
    out_ref[...] = (jnp.dot(h, wh_ref[...], preferred_element_type=jnp.float32)
                    + bh_ref[...])


def _box_head_kernel_split(x_ref, w6_ref, b6_ref, w7_ref, b7_ref, wh_ref, bh_ref,
                           feat_ref, pred_ref):
    """rep >= 128: no identity pass-through; bf16 feature tile + narrow predictor slab."""
    cdt = w6_ref.dtype
    x = x_ref[...].astype(cdt)
    h = jnp.dot(x, w6_ref[...], preferred_element_type=jnp.float32) + b6_ref[...]
    h = jnp.maximum(h, 0.0).astype(cdt)
    h32 = jnp.dot(h, w7_ref[...], preferred_element_type=jnp.float32) + b7_ref[...]
    h32 = jnp.maximum(h32, 0.0)
    feat_ref[...] = h32.astype(feat_ref.dtype)
    h = h32.astype(cdt)
    pred_ref[...] = (jnp.dot(h, wh_ref[...], preferred_element_type=jnp.float32)
                     + bh_ref[...])


def pack_box_head_params(params, compute_dtype=jnp.bfloat16):
    """One-time repack of torch-style Linear params (already [in, out]) for the kernel."""
    w6, b6, w7, b7, wc, bc, wb, bb = params
    d, rep = w6.shape
    nc = wc.shape[1]
    rep_pad = _round_up(rep, LANE)
    packed = rep < LANE      # fold [I | wc | wb] only when rep does not fill a lane row

    w6p = jnp.zeros((d, rep_pad), jnp.float32).at[:, :rep].set(w6)
    b6p = jnp.zeros((1, rep_pad), jnp.float32).at[:, :rep].set(b6.reshape(1, rep))
    w7p = jnp.zeros((rep_pad, rep_pad), jnp.float32).at[:rep, :rep].set(w7)
    b7p = jnp.zeros((1, rep_pad), jnp.float32).at[:, :rep].set(b7.reshape(1, rep))

    if packed:
        out_pad = _round_up(rep + 5 * nc, LANE)
        whp = jnp.zeros((rep_pad, out_pad), jnp.float32)
        whp = whp.at[:rep, :rep].set(jnp.eye(rep, dtype=jnp.float32))   # feature pass-thru
        whp = whp.at[:rep, rep:rep + nc].set(wc)                        # cls_score
        whp = whp.at[:rep, rep + nc:rep + 5 * nc].set(wb)               # bbox_pred
        bhp = jnp.zeros((1, out_pad), jnp.float32)
        bhp = bhp.at[:, rep:rep + nc].set(bc.reshape(1, nc))
        bhp = bhp.at[:, rep + nc:rep + 5 * nc].set(bb.reshape(1, 4 * nc))
    else:
        out_pad = _round_up(5 * nc, LANE)
        whp = jnp.zeros((rep_pad, out_pad), jnp.float32)
        whp = whp.at[:rep, :nc].set(wc)
        whp = whp.at[:rep, nc:5 * nc].set(wb)
        bhp = jnp.zeros((1, out_pad), jnp.float32)
        bhp = bhp.at[:, :nc].set(bc.reshape(1, nc))
        bhp = bhp.at[:, nc:5 * nc].set(bb.reshape(1, 4 * nc))

    return dict(packed=packed, rep=rep, nc=nc, rep_pad=rep_pad, out_pad=out_pad,
                w6p=w6p.astype(compute_dtype), b6p=b6p,
                w7p=w7p.astype(compute_dtype), b7p=b7p,
                whp=whp.astype(compute_dtype), bhp=bhp)


def box_head_pallas(pooled_flat, pp, *, tile_r=None):
    """pooled_flat: [R, D] f32. Returns (x [R,rep], class_logits [R,nc], box_reg [R,4nc])."""
    w6p, b6p, w7p = pp["w6p"], pp["b6p"], pp["w7p"]
    b7p, whp, bhp = pp["b7p"], pp["whp"], pp["bhp"]
    rep, nc, rep_pad, out_pad, packed = (pp["rep"], pp["nc"], pp["rep_pad"],
                                         pp["out_pad"], pp["packed"])
    r, d = pooled_flat.shape

    weight_bytes = sum(int(p.size) * p.dtype.itemsize
                       for p in (w6p, b6p, w7p, b7p, whp, bhp))
    in_row_bytes = d * pooled_flat.dtype.itemsize
    out_row_bytes = out_pad * 4 + (0 if packed else rep_pad * 2)

    cap = _vmem_capacity_bytes()
    budget = int(0.6 * cap)                 # per-chip budget (64 MiB v7x, 128 MiB v5e/v6e)

    # ROI tiling: tiny R -> single 16-row-aligned invocation (bf16 sublane packing);
    # large R -> biggest of {512, 256, 128} rows whose double-buffered tiles + weights
    # fit the VMEM budget (v5e/v6e usually get 256/512, v7x typically stays at 128).
    if tile_r is not None:
        tr = tile_r
    elif r <= LANE:
        tr = _round_up(max(r, 1), 16)
    else:
        tr = LANE
        for cand in (512, 256):
            need = 2 * weight_bytes + 2 * cand * (in_row_bytes + out_row_bytes) + (2 << 20)
            if need <= budget:
                tr = cand
                break
    r_pad = _round_up(max(r, 1), tr)

    # Rows padded only up to the tile multiple; NO dtype cast / lane pad in the wrapper.
    x = pooled_flat if r_pad == r else jnp.pad(pooled_flat, ((0, r_pad - r), (0, 0)))

    grid = (r_pad // tr,)
    resident = lambda i: (0, 0)     # weights/biases VMEM-resident across ROI tiles
    streamed = lambda i: (i, 0)     # pooled rows / outputs stream with the grid

    head_cols = out_pad if packed else out_pad + rep_pad
    flops = 2 * r_pad * (d * rep_pad + rep_pad * rep_pad + rep_pad * head_cols)
    io_bytes = int(x.size) * x.dtype.itemsize + weight_bytes + r_pad * out_row_bytes
    vmem_need = weight_bytes + 2 * tr * (in_row_bytes + out_row_bytes)
    vmem_limit = int(min(max(budget, int(1.25 * vmem_need) + (2 << 20)), 0.9 * cap))

    if packed:
        kernel = _box_head_kernel_packed
        out_shape = jax.ShapeDtypeStruct((r_pad, out_pad), jnp.float32)
        out_specs = pl.BlockSpec((tr, out_pad), streamed)
    else:
        kernel = _box_head_kernel_split
        out_shape = (jax.ShapeDtypeStruct((r_pad, rep_pad), jnp.bfloat16),
                     jax.ShapeDtypeStruct((r_pad, out_pad), jnp.float32))
        out_specs = (pl.BlockSpec((tr, rep_pad), streamed),
                     pl.BlockSpec((tr, out_pad), streamed))

    def build(single_buffer_weights):
        res_kw = {}
        if single_buffer_weights:
            # Grid-invariant operands: single VMEM buffer (no double-buffering) so the
            # bf16 weight set is resident exactly once.
            res_kw = dict(pipeline_mode=pl.Buffered(1))
        in_specs = [
            pl.BlockSpec((tr, d), streamed),
            pl.BlockSpec((d, rep_pad), resident, **res_kw),
            pl.BlockSpec((1, rep_pad), resident, **res_kw),
            pl.BlockSpec((rep_pad, rep_pad), resident, **res_kw),
            pl.BlockSpec((1, rep_pad), resident, **res_kw),
            pl.BlockSpec((rep_pad, out_pad), resident, **res_kw),
            pl.BlockSpec((1, out_pad), resident, **res_kw),
        ]
        return pl.pallas_call(
            kernel,
            out_shape=out_shape,
            grid=grid,
            in_specs=in_specs,
            out_specs=out_specs,
            # TODO(synk): on v7x megacore, "parallel" makes each TC DMA its own copy of
            # the resident weights; if xprof shows HBM-bound at prod size, place the
            # weights in pltpu.VMEM_SHARED or keep small-R grids on one core.
            compiler_params=pltpu.CompilerParams(
                dimension_semantics=("parallel",),
                vmem_limit_bytes=vmem_limit),
            cost_estimate=pl.CostEstimate(flops=flops, transcendentals=0,
                                          bytes_accessed=io_bytes),
        )

    args = (x, w6p, b6p, w7p, b7p, whp, bhp)
    try:
        outs = build(True)(*args)
    except Exception:
        # Fallback for jax versions without BlockSpec pipeline_mode support.
        outs = build(False)(*args)

    if packed:
        slab = outs[:r]
        feat = slab[:, :rep]
        class_logits = slab[:, rep:rep + nc]
        box_regression = slab[:, rep + nc:rep + 5 * nc]
    else:
        feat = outs[0][:r, :rep]
        pred = outs[1][:r]
        class_logits = pred[:, :nc]
        box_regression = pred[:, nc:5 * nc]
    return feat, class_logits, box_regression


def roi_align(feats, boxes, batch_idx, out_size, spatial_scale):
    """Simplified ROIAlign (one bilinear sample per bin center). JAX glue.

    feats: [B, C, H, W]; boxes: [R, 4] (x1, y1, x2, y2) in image coords;
    batch_idx: [R] int32.  Returns [R, C, out_size, out_size].
    """
    _, _, H, W = feats.shape

    def one_roi(box, bi):
        x1, y1, x2, y2 = box * spatial_scale
        bw = (x2 - x1) / out_size
        bh = (y2 - y1) / out_size
        idx = jnp.arange(out_size, dtype=jnp.float32) + 0.5
        cx = x1 + idx * bw
        cy = y1 + idx * bh
        fb = feats[bi]                           # [C, H, W]

        y0 = jnp.floor(cy)
        x0 = jnp.floor(cx)
        wy = cy - y0
        wx = cx - x0
        y0i = jnp.clip(y0, 0, H - 1).astype(jnp.int32)
        y1i = jnp.clip(y0 + 1, 0, H - 1).astype(jnp.int32)
        x0i = jnp.clip(x0, 0, W - 1).astype(jnp.int32)
        x1i = jnp.clip(x0 + 1, 0, W - 1).astype(jnp.int32)

        def g(yi, xi):                            # -> [C, P, P]
            return fb[:, yi, :][:, :, xi]

        wy0 = (1.0 - wy)[None, :, None]
        wy1 = wy[None, :, None]
        wx0 = (1.0 - wx)[None, None, :]
        wx1 = wx[None, None, :]
        return (wy0 * wx0 * g(y0i, x0i) + wy0 * wx1 * g(y0i, x1i)
                + wy1 * wx0 * g(y1i, x0i) + wy1 * wx1 * g(y1i, x1i))

    return jax.vmap(one_roi)(boxes, batch_idx)    # [R, C, P, P]


# TODO(synk): post_processor (softmax + box decode + NMS), loss_evaluator and
# samp_processor (proposal subsampling/matching) have no clean Pallas equivalent;
# this reproduces the inference hot path (feature_extractor + predictor).
def roi_box_head_forward(features, boxes, batch_idx, n_per_img, packed_params,
                         spatial_scale):
    """Mirrors ROIBoxHead.forward (eval, RELATION_ON=False) up to post-processing."""
    pooled = roi_align(features, boxes, batch_idx, POOL, spatial_scale)
    pooled_flat = pooled.reshape(pooled.shape[0], -1)     # torch x.view(x.size(0), -1)
    x, class_logits, box_regression = box_head_pallas(pooled_flat, packed_params)
    # add_predict_logits: slice logits per image (glue)
    n_images = features.shape[0]
    split_idxs = [n_per_img * i for i in range(1, n_images)]
    per_image_logits = jnp.split(class_logits, split_idxs, axis=0)
    return x, class_logits, box_regression, per_image_logits


if __name__ == "__main__":
    key = jax.random.PRNGKey(0)
    ks = jax.random.split(key, 12)

    B, C, FEAT = 2, 4, 16
    spatial_scale = FEAT / IMG
    n_per_img = 8
    R = B * n_per_img

    # features (one FPN level), NCHW
    features = jax.random.normal(ks[0], (B, C, FEAT, FEAT), dtype=jnp.float32)

    # proposals: (x1, y1, x2, y2) boxes in image coordinates
    xy1 = jax.random.uniform(ks[1], (R, 2), minval=0.0, maxval=IMG / 2.0)
    wh = jax.random.uniform(ks[2], (R, 2), minval=8.0, maxval=IMG / 2.0)
    boxes = jnp.concatenate([xy1, jnp.minimum(xy1 + wh, IMG - 1.0)], axis=-1)
    batch_idx = jnp.repeat(jnp.arange(B, dtype=jnp.int32), n_per_img)

    # torch Linear is y = x W^T + b; weights are stored here already transposed [in, out]
    D = C * POOL * POOL
    w6 = 0.1 * jax.random.normal(ks[3], (D, REP), jnp.float32)
    b6 = 0.01 * jax.random.normal(ks[4], (REP,), jnp.float32)
    w7 = 0.1 * jax.random.normal(ks[5], (REP, REP), jnp.float32)
    b7 = 0.01 * jax.random.normal(ks[6], (REP,), jnp.float32)
    wc = 0.1 * jax.random.normal(ks[7], (REP, NUM_CLASSES), jnp.float32)
    bc = 0.01 * jax.random.normal(ks[8], (NUM_CLASSES,), jnp.float32)
    wb = 0.1 * jax.random.normal(ks[9], (REP, 4 * NUM_CLASSES), jnp.float32)
    bb = 0.01 * jax.random.normal(ks[10], (4 * NUM_CLASSES,), jnp.float32)
    params = (w6, b6, w7, b7, wc, bc, wb, bb)
    packed_params = pack_box_head_params(params)    # one-time repack (bf16, lane-padded)

    x, class_logits, box_regression, per_image_logits = roi_box_head_forward(
        features, boxes, batch_idx, n_per_img, packed_params, spatial_scale)
    jax.block_until_ready((x, class_logits, box_regression))

    # shape checks
    assert x.shape == (R, REP)
    assert class_logits.shape == (R, NUM_CLASSES)
    assert box_regression.shape == (R, 4 * NUM_CLASSES)
    assert len(per_image_logits) == B and per_image_logits[0].shape == (n_per_img, NUM_CLASSES)

    # numeric check vs pure-JAX f32 reference (bf16-compute tolerance)
    pooled_ref = roi_align(features, boxes, batch_idx, POOL, spatial_scale).reshape(R, -1)
    h_ref = jnp.maximum(pooled_ref @ w6 + b6, 0.0)
    h_ref = jnp.maximum(h_ref @ w7 + b7, 0.0)
    cls_ref = h_ref @ wc + bc
    box_ref = h_ref @ wb + bb
    np.testing.assert_allclose(np.asarray(x), np.asarray(h_ref), rtol=5e-2, atol=2e-2)
    np.testing.assert_allclose(np.asarray(class_logits), np.asarray(cls_ref), rtol=5e-2, atol=2e-2)
    np.testing.assert_allclose(np.asarray(box_regression), np.asarray(box_ref), rtol=5e-2, atol=2e-2)

    print("KERNEL_OK")
</pallas_src>

<mosaic_0001>
module attributes {stable_mosaic.version = 11 : i64} {
  func.func @_box_head_kernel_packed(%arg0: i32, %arg1: memref<16x64xf32, #tpu.memory_space<vmem>>, %arg2: memref<64x128xbf16, #tpu.memory_space<vmem>>, %arg3: memref<1x128xf32, #tpu.memory_space<vmem>>, %arg4: memref<128x128xbf16, #tpu.memory_space<vmem>>, %arg5: memref<1x128xf32, #tpu.memory_space<vmem>>, %arg6: memref<128x128xbf16, #tpu.memory_space<vmem>>, %arg7: memref<1x128xf32, #tpu.memory_space<vmem>>, %arg8: memref<16x128xf32, #tpu.memory_space<vmem>>) attributes {dimension_semantics = [#tpu.dimension_semantics<parallel>], iteration_bounds = array<i64: 1>, scalar_prefetch = 0 : i64, scratch_operands = 0 : i64, tpu.core_type = #tpu.core_type<tc>, window_params = [{transform_indices = @transform_0, window_bounds = array<i64: 16, 64>}, {pipeline_mode = #tpu.pipeline_mode<synchronous>, transform_indices = @transform_1, window_bounds = array<i64: 64, 128>}, {pipeline_mode = #tpu.pipeline_mode<synchronous>, transform_indices = @transform_2, window_bounds = array<i64: 1, 128>}, {pipeline_mode = #tpu.pipeline_mode<synchronous>, transform_indices = @transform_3, window_bounds = array<i64: 128, 128>}, {pipeline_mode = #tpu.pipeline_mode<synchronous>, transform_indices = @transform_4, window_bounds = array<i64: 1, 128>}, {pipeline_mode = #tpu.pipeline_mode<synchronous>, transform_indices = @transform_5, window_bounds = array<i64: 128, 128>}, {pipeline_mode = #tpu.pipeline_mode<synchronous>, transform_indices = @transform_6, window_bounds = array<i64: 1, 128>}, {transform_indices = @transform_7, window_bounds = array<i64: 16, 128>}]} {
    %c0 = arith.constant 0 : index
    %c0_0 = arith.constant 0 : index
    %0 = vector.load %arg1[%c0, %c0_0] : memref<16x64xf32, #tpu.memory_space<vmem>>, vector<16x64xf32>
    %1 = arith.truncf %0 : vector<16x64xf32> to vector<16x64xbf16>
    %c0_1 = arith.constant 0 : index
    %c0_2 = arith.constant 0 : index
    %2 = vector.load %arg2[%c0_1, %c0_2] : memref<64x128xbf16, #tpu.memory_space<vmem>>, vector<64x128xbf16>
    %cst = arith.constant dense<0.000000e+00> : vector<16x128xf32>
    %3 = tpu.matmul %1, %2, %cst {dimension_numbers = #tpu.dot_dimension_numbers<[1], [0], [0], [1], [0, 0, 1, 1], [], []>} : vector<16x64xbf16>, vector<64x128xbf16>, vector<16x128xf32> -> vector<16x128xf32>
    %c0_3 = arith.constant 0 : index
    %c0_4 = arith.constant 0 : index
    %4 = vector.load %arg3[%c0_3, %c0_4] : memref<1x128xf32, #tpu.memory_space<vmem>>, vector<1x128xf32>
    %5 = vector.broadcast %4 : vector<1x128xf32> to vector<16x128xf32>
    %6 = arith.addf %3, %5 : vector<16x128xf32>
    %cst_5 = arith.constant 0.000000e+00 : f32
    %7 = vector.broadcast %cst_5 : f32 to vector<16x128xf32>
    %8 = arith.maximumf %6, %7 : vector<16x128xf32>
    %9 = arith.truncf %8 : vector<16x128xf32> to vector<16x128xbf16>
    %c0_6 = arith.constant 0 : index
    %c0_7 = arith.constant 0 : index
    %10 = vector.load %arg4[%c0_6, %c0_7] : memref<128x128xbf16, #tpu.memory_space<vmem>>, vector<128x128xbf16>
    %cst_8 = arith.constant dense<0.000000e+00> : vector<16x128xf32>
    %11 = tpu.matmul %9, %10, %cst_8 {dimension_numbers = #tpu.dot_dimension_numbers<[1], [0], [0], [1], [0, 0, 1, 1], [], []>} : vector<16x128xbf16>, vector<128x128xbf16>, vector<16x128xf32> -> vector<16x128xf32>
    %c0_9 = arith.constant 0 : index
    %c0_10 = arith.constant 0 : index
    %12 = vector.load %arg5[%c0_9, %c0_10] : memref<1x128xf32, #tpu.memory_space<vmem>>, vector<1x128xf32>
    %13 = vector.broadcast %12 : vector<1x128xf32> to vector<16x128xf32>
    %14 = arith.addf %11, %13 : vector<16x128xf32>
    %cst_11 = arith.constant 0.000000e+00 : f32
    %15 = vector.broadcast %cst_11 : f32 to vector<16x128xf32>
    %16 = arith.maximumf %14, %15 : vector<16x128xf32>
    %17 = arith.truncf %16 : vector<16x128xf32> to vector<16x128xbf16>
    %c0_12 = arith.constant 0 : index
    %c0_13 = arith.constant 0 : index
    %18 = vector.load %arg6[%c0_12, %c0_13] : memref<128x128xbf16, #tpu.memory_space<vmem>>, vector<128x128xbf16>
    %cst_14 = arith.constant dense<0.000000e+00> : vector<16x128xf32>
    %19 = tpu.matmul %17, %18, %cst_14 {dimension_numbers = #tpu.dot_dimension_numbers<[1], [0], [0], [1], [0, 0, 1, 1], [], []>} : vector<16x128xbf16>, vector<128x128xbf16>, vector<16x128xf32> -> vector<16x128xf32>
    %c0_15 = arith.constant 0 : index
    %c0_16 = arith.constant 0 : index
    %20 = vector.load %arg7[%c0_15, %c0_16] : memref<1x128xf32, #tpu.memory_space<vmem>>, vector<1x128xf32>
    %21 = vector.broadcast %20 : vector<1x128xf32> to vector<16x128xf32>
    %22 = arith.addf %19, %21 : vector<16x128xf32>
    %c0_17 = arith.constant 0 : index
    %c0_18 = arith.constant 0 : index
    %23 = vector.load %arg8[%c0_17, %c0_18] : memref<16x128xf32, #tpu.memory_space<vmem>>, vector<16x128xf32>
    tpu.vector_store %arg8[%c0_17, %c0_18], %22 {strides = array<i32>} : memref<16x128xf32, #tpu.memory_space<vmem>>, vector<16x128xf32>,
    return
  }
  func.func @transform_0(%arg0: i32) -> (i32, i32) {
    %c0_i32 = arith.constant 0 : i32
    %c0_i32_0 = arith.constant 0 : i32
    return %arg0, %c0_i32 : i32, i32
  }
  func.func @transform_1(%arg0: i32) -> (i32, i32) {
    %c0_i32 = arith.constant 0 : i32
    %c0_i32_0 = arith.constant 0 : i32
    %c0_i32_1 = arith.constant 0 : i32
    return %c0_i32, %c0_i32_0 : i32, i32
  }
  func.func @transform_2(%arg0: i32) -> (i32, i32) {
    %c0_i32 = arith.constant 0 : i32
    %c0_i32_0 = arith.constant 0 : i32
    %c0_i32_1 = arith.constant 0 : i32
    return %c0_i32, %c0_i32_0 : i32, i32
  }
  func.func @transform_3(%arg0: i32) -> (i32, i32) {
    %c0_i32 = arith.constant 0 : i32
    %c0_i32_0 = arith.constant 0 : i32
    %c0_i32_1 = arith.constant 0 : i32
    return %c0_i32, %c0_i32_0 : i32, i32
  }
  func.func @transform_4(%arg0: i32) -> (i32, i32) {
    %c0_i32 = arith.constant 0 : i32
    %c0_i32_0 = arith.constant 0 : i32
    %c0_i32_1 = arith.constant 0 : i32
    return %c0_i32, %c0_i32_0 : i32, i32
  }
  func.func @transform_5(%arg0: i32) -> (i32, i32) {
    %c0_i32 = arith.constant 0 : i32
    %c0_i32_0 = arith.constant 0 : i32
    %c0_i32_1 = arith.constant 0 : i32
    return %c0_i32, %c0_i32_0 : i32, i32
  }
  func.func @transform_6(%arg0: i32) -> (i32, i32) {
    %c0_i32 = arith.constant 0 : i32
    %c0_i32_0 = arith.constant 0 : i32
    %c0_i32_1 = arith.constant 0 : i32
    return %c0_i32, %c0_i32_0 : i32, i32
  }
  func.func @transform_7(%arg0: i32) -> (i32, i32) {
    %c0_i32 = arith.constant 0 : i32
    %c0_i32_0 = arith.constant 0 : i32
    return %arg0, %c0_i32 : i32, i32
  }
}

module attributes {stable_mosaic.version = 11 : i64} {
  func.func @_box_head_kernel_packed(%arg0: i32, %arg1: memref<16x64xf32, #tpu.memory_space<vmem>>, %arg2: memref<64x128xbf16, #tpu.memory_space<vmem>>, %arg3: memref<1x128xf32, #tpu.memory_space<vmem>>, %arg4: memref<128x128xbf16, #tpu.memory_space<vmem>>, %arg5: memref<1x128xf32, #tpu.memory_space<vmem>>, %arg6: memref<128x128xbf16, #tpu.memory_space<vmem>>, %arg7: memref<1x128xf32, #tpu.memory_space<vmem>>, %arg8: memref<16x128xf32, #tpu.memory_space<vmem>>) attributes {dimension_semantics = [#tpu.dimension_semantics<parallel>], iteration_bounds = array<i64: 1>, scalar_prefetch = 0 : i64, scratch_operands = 0 : i64, tpu.core_type = #tpu.core_type<tc>, window_params = [{transform_indices = @transform_0, window_bounds = array<i64: 16, 64>}, {pipeline_mode = #tpu.pipeline_mode<synchronous>, transform_indices = @transform_1, window_bounds = array<i64: 64, 128>}, {pipeline_mode = #tpu.pipeline_mode<synchronous>, transform_indices = @transform_2, window_bounds = array<i64: 1, 128>}, {pipeline_mode = #tpu.pipeline_mode<synchronous>, transform_indices = @transform_3, window_bounds = array<i64: 128, 128>}, {pipeline_mode = #tpu.pipeline_mode<synchronous>, transform_indices = @transform_4, window_bounds = array<i64: 1, 128>}, {pipeline_mode = #tpu.pipeline_mode<synchronous>, transform_indices = @transform_5, window_bounds = array<i64: 128, 128>}, {pipeline_mode = #tpu.pipeline_mode<synchronous>, transform_indices = @transform_6, window_bounds = array<i64: 1, 128>}, {transform_indices = @transform_7, window_bounds = array<i64: 16, 128>}]} {
    %c0 = arith.constant 0 : index
    %c0_0 = arith.constant 0 : index
    %0 = vector.load %arg1[%c0, %c0_0] : memref<16x64xf32, #tpu.memory_space<vmem>>, vector<16x64xf32>
    %1 = arith.truncf %0 : vector<16x64xf32> to vector<16x64xbf16>
    %c0_1 = arith.constant 0 : index
    %c0_2 = arith.constant 0 : index
    %2 = vector.load %arg2[%c0_1, %c0_2] : memref<64x128xbf16, #tpu.memory_space<vmem>>, vector<64x128xbf16>
    %cst = arith.constant dense<0.000000e+00> : vector<16x128xf32>
    %3 = tpu.matmul %1, %2, %cst {dimension_numbers = #tpu.dot_dimension_numbers<[1], [0], [0], [1], [0, 0, 1, 1], [], []>} : vector<16x64xbf16>, vector<64x128xbf16>, vector<16x128xf32> -> vector<16x128xf32>
    %c0_3 = arith.constant 0 : index
    %c0_4 = arith.constant 0 : index
    %4 = vector.load %arg3[%c0_3, %c0_4] : memref<1x128xf32, #tpu.memory_space<vmem>>, vector<1x128xf32>
    %5 = vector.broadcast %4 : vector<1x128xf32> to vector<16x128xf32>
    %6 = arith.addf %3, %5 : vector<16x128xf32>
    %cst_5 = arith.constant 0.000000e+00 : f32
    %7 = vector.broadcast %cst_5 : f32 to vector<16x128xf32>
    %8 = arith.maximumf %6, %7 : vector<16x128xf32>
    %9 = arith.truncf %8 : vector<16x128xf32> to vector<16x128xbf16>
    %c0_6 = arith.constant 0 : index
    %c0_7 = arith.constant 0 : index
    %10 = vector.load %arg4[%c0_6, %c0_7] : memref<128x128xbf16, #tpu.memory_space<vmem>>, vector<128x128xbf16>
    %cst_8 = arith.constant dense<0.000000e+00> : vector<16x128xf32>
    %11 = tpu.matmul %9, %10, %cst_8 {dimension_numbers = #tpu.dot_dimension_numbers<[1], [0], [0], [1], [0, 0, 1, 1], [], []>} : vector<16x128xbf16>, vector<128x128xbf16>, vector<16x128xf32> -> vector<16x128xf32>
    %c0_9 = arith.constant 0 : index
    %c0_10 = arith.constant 0 : index
    %12 = vector.load %arg5[%c0_9, %c0_10] : memref<1x128xf32, #tpu.memory_space<vmem>>, vector<1x128xf32>
    %13 = vector.broadcast %12 : vector<1x128xf32> to vector<16x128xf32>
    %14 = arith.addf %11, %13 : vector<16x128xf32>
    %cst_11 = arith.constant 0.000000e+00 : f32
    %15 = vector.broadcast %cst_11 : f32 to vector<16x128xf32>
    %16 = arith.maximumf %14, %15 : vector<16x128xf32>
    %17 = arith.truncf %16 : vector<16x128xf32> to vector<16x128xbf16>
    %c0_12 = arith.constant 0 : index
    %c0_13 = arith.constant 0 : index
    %18 = vector.load %arg6[%c0_12, %c0_13] : memref<128x128xbf16, #tpu.memory_space<vmem>>, vector<128x128xbf16>
    %cst_14 = arith.constant dense<0.000000e+00> : vector<16x128xf32>
    %19 = tpu.matmul %17, %18, %cst_14 {dimension_numbers = #tpu.dot_dimension_numbers<[1], [0], [0], [1], [0, 0, 1, 1], [], []>} : vector<16x128xbf16>, vector<128x128xbf16>, vector<16x128xf32> -> vector<16x128xf32>
    %c0_15 = arith.constant 0 : index
    %c0_16 = arith.constant 0 : index
    %20 = vector.load %arg7[%c0_15, %c0_16] : memref<1x128xf32, #tpu.memory_space<vmem>>, vector<1x128xf32>
    %21 = vector.broadcast %20 : vector<1x128xf32> to vector<16x128xf32>
    %22 = arith.addf %19, %21 : vector<16x128xf32>
    %c0_17 = arith.constant 0 : index
    %c0_18 = arith.constant 0 : index
    %23 = vector.load %arg8[%c0_17, %c0_18] : memref<16x128xf32, #tpu.memory_space<vmem>>, vector<16x128xf32>
    tpu.vector_store %arg8[%c0_17, %c0_18], %22 {strides = array<i32>} : memref<16x128xf32, #tpu.memory_space<vmem>>, vector<16x128xf32>,
    return
  }
  func.func @transform_0(%arg0: i32) -> (i32, i32) {
    %c0_i32 = arith.constant 0 : i32
    %c0_i32_0 = arith.constant 0 : i32
    return %arg0, %c0_i32 : i32, i32
  }
  func.func @transform_1(%arg0: i32) -> (i32, i32) {
    %c0_i32 = arith.constant 0 : i32
    %c0_i32_0 = arith.constant 0 : i32
    %c0_i32_1 = arith.constant 0 : i32
    return %c0_i32, %c0_i32_0 : i32, i32
  }
  func.func @transform_2(%arg0: i32) -> (i32, i32) {
    %c0_i32 = arith.constant 0 : i32
    %c0_i32_0 = arith.constant 0 : i32
    %c0_i32_1 = arith.constant 0 : i32
    return %c0_i32, %c0_i32_0 : i32, i32
  }
  func.func @transform_3(%arg0: i32) -> (i32, i32) {
    %c0_i32 = arith.constant 0 : i32
    %c0_i32_0 = arith.constant 0 : i32
    %c0_i32_1 = arith.constant 0 : i32
    return %c0_i32, %c0_i32_0 : i32, i32
  }
  func.func @transform_4(%arg0: i32) -> (i32, i32) {
    %c0_i32 = arith.constant 0 : i32
    %c0_i32_0 = arith.constant 0 : i32
    %c0_i32_1 = arith.constant 0 : i32
    return %c0_i32, %c0_i32_0 : i32, i32
  }
  func.func @transform_5(%arg0: i32) -> (i32, i32) {
    %c0_i32 = arith.constant 0 : i32
    %c0_i32_0 = arith.constant 0 : i32
    %c0_i32_1 = arith.constant 0 : i32
    return %c0_i32, %c0_i32_0 : i32, i32
  }
  func.func @transform_6(%arg0: i32) -> (i32, i32) {
    %c0_i32 = arith.constant 0 : i32
    %c0_i32_0 = arith.constant 0 : i32
    %c0_i32_1 = arith.constant 0 : i32
    return %c0_i32, %c0_i32_0 : i32, i32
  }
  func.func @transform_7(%arg0: i32) -> (i32, i32) {
    %c0_i32 = arith.constant 0 : i32
    %c0_i32_0 = arith.constant 0 : i32
    return %arg0, %c0_i32 : i32, i32
  }
}

</mosaic_0001>

<bundles_post_ra>
// kernel: tpu_custom_call.1
= control target key start
LH: loop header
LB: loop body
LE: loop exit
PB: predicated region body
PF: predicated region fallthrough
CT: control target
= control target key end

     0   :  { %12 = vsyncpa [#allocation3], 0  ;;  %s837_s0 = inlined_call_operand.hbm [shape: f32[16,64], index: 0, kind: input, shape index: {}]   ;;  %s838_s1 = inlined_call_operand.hbm [shape: bf16[64,128], index: 1, kind: input, shape index: {}]   ;;  %s839_s2 = inlined_call_operand.vmem [shape: f32[1,128], index: 2, kind: input, shape index: {}]   ;;  %s840_s3 = inlined_call_operand.hbm [shape: bf16[128,128], index: 3, kind: input, shape index: {}]   ;;  %s841_s4 = inlined_call_operand.vmem [shape: f32[1,128], index: 4, kind: input, shape index: {}]   ;;  %s842_s5 = inlined_call_operand.hbm [shape: bf16[128,128], index: 5, kind: input, shape index: {}]   ;;  %s843_s6 = inlined_call_operand.vmem [shape: f32[1,128], index: 6, kind: input, shape index: {}]   ;;  %s844_s7 = inlined_call_operand.hbm [shape: f32[16,128], index: 7, kind: output, shape index: {}]  }
   0x1   :  { %13 = vsyncpa [#allocation6], 0 }
   0x2   :  { %14 = vsyncpa [#allocation9], 0 }
   0x3   :  { %15 = vsyncpa [#allocation4], 0  ;;  %s669_s24 = smov [#allocation5]   ;;  %s551_s28 = scalar_lea.hbm %s838_s1, 512 }
   0x4   :  { %s33_s25 = sshll.u32 %s669_s24, 4  ;;  %p552_p0 = scmp.ne.s32.totalorder %s838_s1, %s551_s28  ;;  %s34_s25 = int_to_ptr.vmem [resolvable:$true] %s33_s25 }
   0x5   :  { %p555_p1 = scmp.lt.u32.totalorder %s551_s28, %s838_s1 }
   0x7   :  { %p557_p2 = pnand %p555_p1, %p552_p0 }
   0x9   :  { %560 = shalt.err (!%p557_p2)
}
   0xa   :  { %s561_s10 = scalar_lea.vmem %s34_s25, 512  ;;  %p566_p4 = scmp.lt.s32.totalorder %s34_s25, %s34_s25 }
   0xb   :  { %p562_p3 = scmp.ne.s32.totalorder %s34_s25, %s561_s10  ;;  %p567_p5 = scmp.lt.s32.totalorder %s561_s10, %s561_s10 }
   0xd   :  { %p568_p6 = por %p567_p5, %p566_p4 }
   0xf   :  { %p569_p7 = pnand %p568_p6, %p562_p3 }
  0x11   :  { %572 = shalt.err (!%p569_p7)
}
  0x12   :  { %s670_s11 = smov 64   ;;  %s671_s12 = smov 4  }
  0x13   :  { %39 = dma.hbm_to_vmem [thread:$0]  %s838_s1, 512, %s34_s25, [#allocation6], %s670_s11, %s670_s11, %s671_s12  }
  0x14   :  { %s672_s15 = smov [#allocation2]   ;;  %s573_s19 = scalar_lea.hbm %s837_s0, 256 }
  0x15   :  { %s21_s16 = sshll.u32 %s672_s15, 4  ;;  %p574_p8 = scmp.ne.s32.totalorder %s837_s0, %s573_s19  ;;  %s22_s16 = int_to_ptr.vmem [resolvable:$true] %s21_s16 }
  0x16   :  { %p577_p9 = scmp.lt.u32.totalorder %s573_s19, %s837_s0 }
  0x18   :  { %p579_p10 = pnand %p577_p9, %p574_p8 }
  0x1a   :  { %582 = shalt.err (!%p579_p10)
}
  0x1b   :  { %s583_s24 = scalar_lea.vmem %s22_s16, 256  ;;  %p588_p12 = scmp.lt.s32.totalorder %s22_s16, %s22_s16 }
  0x1c   :  { %p584_p11 = scmp.ne.s32.totalorder %s22_s16, %s583_s24  ;;  %p589_p13 = scmp.lt.s32.totalorder %s583_s24, %s583_s24 }
  0x1e   :  { %p590_p0 = por %p589_p13, %p588_p12 }
  0x20   :  { %p591_p1 = pnand %p590_p0, %p584_p11 }
  0x22   :  { %594 = shalt.err (!%p591_p1)
}
  0x23   :  { %s673_s1 = smov 128   ;;  %s674_s25 = smov 8  }
  0x24   :  { %27 = dma.hbm_to_vmem [thread:$0]  %s837_s0, 256, %s22_s16, [#allocation3], %s673_s1, %s673_s1, %s674_s25  }
  0x25   :  { %s675_s28 = smov [#allocation7]   ;;  %s676_s30 = smov [#allocation8]  }
  0x26   :  { %s47_s29 = sshll.u32 %s675_s28, 4  ;;  %s61_s8 = sshll.u32 %s676_s30, 4  ;;  %s48_s29 = int_to_ptr.vmem [resolvable:$true] %s47_s29  ;;  %s750_s8 = int_to_ptr.vmem [resolvable:$true] %s61_s8 }
  0x27   :  { %s595_s13 = scalar_lea.hbm %s840_s3, 1024 }
  0x28   :  { %p596_p2 = scmp.ne.s32.totalorder %s840_s3, %s595_s13  ;;  %p599_p3 = scmp.lt.u32.totalorder %s595_s13, %s840_s3 }
  0x2a   :  { %p601_p4 = pnand %p599_p3, %p596_p2 }
  0x2c   :  { %604 = shalt.err (!%p601_p4)
}
  0x2d   :  { %s605_s0 = scalar_lea.vmem %s48_s29, 1024  ;;  %p610_p6 = scmp.lt.s32.totalorder %s48_s29, %s48_s29 }
  0x2e   :  { %p606_p5 = scmp.ne.s32.totalorder %s48_s29, %s605_s0  ;;  %p611_p7 = scmp.lt.s32.totalorder %s605_s0, %s605_s0 }
  0x30   :  { %p612_p8 = por %p611_p7, %p610_p6 }
  0x32   :  { %p613_p9 = pnand %p612_p8, %p606_p5 }
  0x34   :  { %616 = shalt.err (!%p613_p9)
}
  0x35   :  { %53 = dma.hbm_to_vmem [thread:$0]  %s840_s3, 1024, %s48_s29, [#allocation6], %s670_s11, %s670_s11, %s671_s12  }
  0x36   :  { %s617_s22 = scalar_lea.hbm %s842_s5, 1024 }
  0x37   :  { %p618_p10 = scmp.ne.s32.totalorder %s842_s5, %s617_s22  ;;  %p621_p11 = scmp.lt.u32.totalorder %s617_s22, %s842_s5 }
  0x39   :  { %p623_p12 = pnand %p621_p11, %p618_p10 }
  0x3b   :  { %626 = shalt.err (!%p623_p12)
}
  0x3c   :  { %s627_s28 = scalar_lea.vmem %s750_s8, 1024  ;;  %p632_p0 = scmp.lt.s32.totalorder %s750_s8, %s750_s8 }
  0x3d   :  { %p628_p13 = scmp.ne.s32.totalorder %s750_s8, %s627_s28  ;;  %p633_p1 = scmp.lt.s32.totalorder %s627_s28, %s627_s28 }
  0x3f   :  { %p634_p2 = por %p633_p1, %p632_p0 }
  0x41   :  { %p635_p3 = pnand %p634_p2, %p628_p13 }
  0x43   :  { %638 = shalt.err (!%p635_p3)
}
  0x44   :  { %67 = dma.hbm_to_vmem [thread:$0]  %s842_s5, 1024, %s750_s8, [#allocation9], %s670_s11, %s670_s11, %s671_s12  }
  0x45   :  { %661 = dma.done.wait [#allocation3], 256  }
  0x46   :  { %662 = vsyncadd [#allocation3], 4294967040 }
  0x47   :  { %663 = dma.done.wait [#allocation6], 1536  }
  0x48   :  { %664 = vsyncadd [#allocation6], 4294965760 }
  0x49   :  { %665 = dma.done.wait [#allocation9], 1024  }
  0x4a   :  { %666 = vsyncadd [#allocation9], 4294966272  ;;  %v677_v0 = vmov 0.0   ;;  %vm678_vm0 = vmmov 0   ;;  %v531_v1 = vld [vmem:[#allocation5] sm:$0xff]   ;;  %v532_v2 = vld [vmem:[#allocation5 + $0x8] sm:$0xff]  }
  0x4b   :  { %468 = vmatprep.subr.bf16.mxu0 %v677_v0  ;;  %476 = vmatprep.mubr.msk.bf16.mxu0 %vm678_vm0, %v677_v0  ;;  %v535_v3 = vld [vmem:[#allocation7] sm:$0xff]   ;;  %v533_v4 = vld [vmem:[#allocation5 + $0x10] sm:$0xff]   ;;  %v536_v5 = vld [vmem:[#allocation7 + $0x8] sm:$0xff]   ;;  %vm125_vm1 = vcmask 523264   ;;  %s679_s9 = smov [#allocation10]  }
  0x4c   :  { %480 = vmatprep.subr.bf16.mxu1 %v677_v0  ;;  %496 = vmatprep.mubr.msk.bf16.mxu1 %vm678_vm0, %v677_v0  ;;  %v534_v6 = vld [vmem:[#allocation5 + $0x18] sm:$0xff]   ;;  %v83_v7 = vld [vmem:[#allocation2] sm:$0xff]  ;;  %v539_v12 = vld [vmem:[#allocation7 + $0x20] sm:$0xff]   ;;  %s407_s10 = sshll.u32 %s679_s9, 4  ;;  %s408_s10 = int_to_ptr.vmem [resolvable:$true] %s407_s10 }
  0x4d   :  { %469 = vmatpush3.bf16.msra.mxu0 %v531_v1  ;;  %481 = vmatpush3.bf16.msra.mxu1 %v535_v3  ;;  %v84_v8 = vld [vmem:[#allocation2 + $0x8] sm:$0xff]  ;;  %v537_v9 = vld [vmem:[#allocation7 + $0x10] sm:$0xff]   ;;  %v540_v13 = vld [vmem:[#allocation7 + $0x28] sm:$0xff]   ;;  %p644_p5 = scmp.lt.s32.totalorder %s408_s10, %s408_s10 }
  0x4e   :  { %470 = vmatprep.subr.bf16.mxu0 %v677_v0  ;;  %482 = vmatprep.subr.bf16.mxu1 %v677_v0  ;;  %v85_v10 = vpack.c.bf16 %v84_v8, %v83_v7  ;;  %v538_v11 = vld [vmem:[#allocation7 + $0x18] sm:$0xff]   ;;  %v541_v14 = vld [vmem:[#allocation7 + $0x30] sm:$0xff]   ;;  %v543_v16 = vld [vmem:[#allocation8] sm:$0xff]  }
  0x4f   :  { %v542_v15 = vld [vmem:[#allocation7 + $0x38] sm:$0xff]   ;;  %v544_v17 = vld [vmem:[#allocation8 + $0x8] sm:$0xff]   ;;  %v545_v18 = vld [vmem:[#allocation8 + $0x10] sm:$0xff]  }
  0x50   :  { %v546_v19 = vld [vmem:[#allocation8 + $0x18] sm:$0xff]   ;;  %v547_v20 = vld [vmem:[#allocation8 + $0x20] sm:$0xff]   ;;  %v548_v21 = vld [vmem:[#allocation8 + $0x28] sm:$0xff]  }
  0x51   :  { %471 = vmatpush3.bf16.msra.mxu0 %v532_v2  ;;  %483 = vmatpush3.bf16.msra.mxu1 %v536_v5  ;;  %v421_v22 = vld [vmem:[%s839_s2] ss:$0 sm:$0xff]  ;;  %v550_v33 = vld [vmem:[#allocation8 + $0x38] sm:$0xff]  }
  0x52   :  { %472 = vmatprep.subr.bf16.mxu0 %v677_v0  ;;  %484 = vmatprep.subr.bf16.mxu1 %v677_v0  ;;  %v549_v32 = vld [vmem:[#allocation8 + $0x30] sm:$0xff]  }
  0x53   :  { %v427_v34 = vld [vmem:[%s841_s4] ss:$0 sm:$0xff]  ;;  %s639_s4 = scalar_lea.vmem %s408_s10, 256 }
  0x54   :  { %v436_v44 = vld [vmem:[%s843_s6] ss:$0 sm:$0xff]  ;;  %p640_p4 = scmp.ne.s32.totalorder %s408_s10, %s639_s4  ;;  %p645_p6 = scmp.lt.s32.totalorder %s639_s4, %s639_s4 }
  0x55   :  { %473 = vmatpush3.bf16.msra.mxu0 %v533_v4  ;;  %485 = vmatpush3.bf16.msra.mxu1 %v537_v9 }
  0x56   :  { %474 = vmatprep.subr.bf16.mxu0 %v677_v0  ;;  %486 = vmatprep.subr.bf16.mxu1 %v677_v0  ;;  %p646_p7 = por %p645_p6, %p644_p5 }
  0x58   :  { %p647_p8 = pnand %p646_p7, %p640_p4 }
  0x59   :  { %475 = vmatpush3.bf16.msra.mxu0 %v534_v6  ;;  %487 = vmatpush3.bf16.msra.mxu1 %v538_v11 }
  0x5a   :  { %500 = vmatprep.subr.bf16.mxu0 %v677_v0  ;;  %488 = vmatprep.subr.bf16.mxu1 %v677_v0 }
  0x5c   :  { %477 = vmatmul.mubr.msk.bf16.vlgmr.msra.gmra.mrb[0].mxu0 %vm125_vm1, %v85_v10 }
  0x5d   :  { %516 = vmatprep.mubr.msk.bf16.mxu0 %vm678_vm0, %v677_v0  ;;  %489 = vmatpush3.bf16.msra.mxu1 %v539_v12 }
  0x5e   :  { %490 = vmatprep.subr.bf16.mxu1 %v677_v0  ;;  %501 = vmatpush3.bf16.msra.mxu0 %v543_v16 }
  0x5f   :  { %502 = vmatprep.subr.bf16.mxu0 %v677_v0 }
  0x61   :  { %491 = vmatpush3.bf16.msra.mxu1 %v540_v13 }
  0x62   :  { %492 = vmatprep.subr.bf16.mxu1 %v677_v0  ;;  %503 = vmatpush3.bf16.msra.mxu0 %v544_v17 }
  0x63   :  { %504 = vmatprep.subr.bf16.mxu0 %v677_v0 }
  0x65   :  { %493 = vmatpush3.bf16.msra.mxu1 %v541_v14 }
  0x66   :  { %494 = vmatprep.subr.bf16.mxu1 %v677_v0  ;;  %505 = vmatpush3.bf16.msra.mxu0 %v545_v18 }
  0x67   :  { %506 = vmatprep.subr.bf16.mxu0 %v677_v0 }
  0x69   :  { %495 = vmatpush3.bf16.msra.mxu1 %v542_v15 }
  0x6a   :  { %507 = vmatpush3.bf16.msra.mxu0 %v546_v19 }
  0x6b   :  { %508 = vmatprep.subr.bf16.mxu0 %v677_v0 }
  0x6e   :  { %509 = vmatpush3.bf16.msra.mxu0 %v547_v20 }
  0x6f   :  { %510 = vmatprep.subr.bf16.mxu0 %v677_v0 }
  0x72   :  { %511 = vmatpush3.bf16.msra.mxu0 %v548_v21 }
  0x73   :  { %512 = vmatprep.subr.bf16.mxu0 %v677_v0 }
  0x76   :  { %513 = vmatpush3.bf16.msra.mxu0 %v549_v32 }
  0x77   :  { %514 = vmatprep.subr.bf16.mxu0 %v677_v0 }
  0x7a   :  { %515 = vmatpush3.bf16.msra.mxu0 %v550_v33 }
 0x12f   :  { %v163_v23 = vpop.f32.mrb[0].mxu0 }
 0x130   :  { %v164_v24 = vadd.f32 %v421_v22, %v163_v23  ;;  %v478_v25 = vpop.f32.mrb[1].mxu0 }
 0x131   :  { %v166_v26 = vpop.f32.mrb[2].mxu0 }
 0x132   :  { %v167_v27 = vadd.f32 %v421_v22, %v166_v26  ;;  %v479_v28 = vpop.f32.mrb[3].mxu0  ;;  %v170_v29 = vmax.f32 %v164_v24, 0.0 }
 0x134   :  { %v171_v30 = vmax.f32 %v167_v27, 0.0 }
 0x136   :  { %v172_v31 = vpack.c.bf16 %v171_v30, %v170_v29 }
 0x138   :  { %497 = vmatmul.mubr.bf16.vlgmr.msra.gmra.mrb[0].mxu1 %v172_v31 }
 0x20b   :  { %v278_v35 = vpop.f32.mrb[0].mxu1 }
 0x20c   :  { %v279_v36 = vadd.f32 %v427_v34, %v278_v35  ;;  %v498_v37 = vpop.f32.mrb[1].mxu1 }
 0x20d   :  { %v281_v38 = vpop.f32.mrb[2].mxu1 }
 0x20e   :  { %v282_v39 = vadd.f32 %v427_v34, %v281_v38  ;;  %v499_v40 = vpop.f32.mrb[3].mxu1  ;;  %v285_v41 = vmax.f32 %v279_v36, 0.0 }
 0x210   :  { %v286_v42 = vmax.f32 %v282_v39, 0.0 }
 0x212   :  { %v287_v43 = vpack.c.bf16 %v286_v42, %v285_v41 }
 0x214   :  { %517 = vmatmul.mubr.bf16.vlgmr.msra.gmra.mrb[4].mxu0 %v287_v43 }
 0x2e7   :  { %v393_v45 = vpop.f32.mrb[4].mxu0 }
 0x2e8   :  { %v394_v46 = vadd.f32 %v436_v44, %v393_v45  ;;  %v518_v47 = vpop.f32.mrb[5].mxu0 }
 0x2e9   :  { %v396_v48 = vpop.f32.mrb[6].mxu0 }
 0x2ea   :  { %400 = vst [vmem:[#allocation10] sm:$0xff] %v394_v46  ;;  %v397_v49 = vadd.f32 %v436_v44, %v396_v48  ;;  %v519_v50 = vpop.f32.mrb[7].mxu0 }
 0x2ec   :  { %401 = vst [vmem:[#allocation10 + $0x8] sm:$0xff] %v397_v49 }
 0x2ed   :  { %650 = shalt.err (!%p647_p8)
}
 0x2ee   :  { %s651_s14 = scalar_lea.hbm %s844_s7, 256 }
 0x2ef   :  { %p652_p9 = scmp.ne.s32.totalorder %s844_s7, %s651_s14  ;;  %p655_p10 = scmp.lt.u32.totalorder %s651_s14, %s844_s7 }
 0x2f1   :  { %p657_p11 = pnand %p655_p10, %p652_p9 }
 0x2f3   :  { %660 = shalt.err (!%p657_p11)
}
 0x2f4   :  { %413 = dma.vmem_to_hbm [thread:$0]  %s408_s10, 256, %s844_s7, [#allocation4], %s673_s1, %s673_s1, %s674_s25  }
 0x2f5   :  { %667 = dma.done.wait [#allocation4], 256  }
 0x2f6   :  { %668 = vsyncadd [#allocation4], 4294967040 }
 0x2f7   :  { %417 = vsyncpa [#allocation3], 1 }
 0x2f8   :  { %418 = vsyncpa [#allocation6], 1 }
 0x2f9   :  { %419 = vsyncpa [#allocation9], 1 }
 0x2fa   :  { %420 = vsyncpa [#allocation4], 1 }

// kernel: tpu_custom_call.1
= control target key start
LH: loop header
LB: loop body
LE: loop exit
PB: predicated region body
PF: predicated region fallthrough
CT: control target
= control target key end

     0   :  { %12 = vsyncpa [#allocation3], 0  ;;  %s837_s0 = inlined_call_operand.hbm [shape: f32[16,64], index: 0, kind: input, shape index: {}]   ;;  %s838_s1 = inlined_call_operand.hbm [shape: bf16[64,128], index: 1, kind: input, shape index: {}]   ;;  %s839_s2 = inlined_call_operand.vmem [shape: f32[1,128], index: 2, kind: input, shape index: {}]   ;;  %s840_s3 = inlined_call_operand.hbm [shape: bf16[128,128], index: 3, kind: input, shape index: {}]   ;;  %s841_s4 = inlined_call_operand.vmem [shape: f32[1,128], index: 4, kind: input, shape index: {}]   ;;  %s842_s5 = inlined_call_operand.hbm [shape: bf16[128,128], index: 5, kind: input, shape index: {}]   ;;  %s843_s6 = inlined_call_operand.vmem [shape: f32[1,128], index: 6, kind: input, shape index: {}]   ;;  %s844_s7 = inlined_call_operand.hbm [shape: f32[16,128], index: 7, kind: output, shape index: {}]  }
   0x1   :  { %13 = vsyncpa [#allocation6], 0 }
   0x2   :  { %14 = vsyncpa [#allocation9], 0 }
   0x3   :  { %15 = vsyncpa [#allocation4], 0  ;;  %s669_s24 = smov [#allocation5]   ;;  %s551_s28 = scalar_lea.hbm %s838_s1, 512 }
   0x4   :  { %s33_s25 = sshll.u32 %s669_s24, 4  ;;  %p552_p0 = scmp.ne.s32.totalorder %s838_s1, %s551_s28  ;;  %s34_s25 = int_to_ptr.vmem [resolvable:$true] %s33_s25 }
   0x5   :  { %p555_p1 = scmp.lt.u32.totalorder %s551_s28, %s838_s1 }
   0x7   :  { %p557_p2 = pnand %p555_p1, %p552_p0 }
   0x9   :  { %560 = shalt.err (!%p557_p2)
}
   0xa   :  { %s561_s10 = scalar_lea.vmem %s34_s25, 512  ;;  %p566_p4 = scmp.lt.s32.totalorder %s34_s25, %s34_s25 }
   0xb   :  { %p562_p3 = scmp.ne.s32.totalorder %s34_s25, %s561_s10  ;;  %p567_p5 = scmp.lt.s32.totalorder %s561_s10, %s561_s10 }
   0xd   :  { %p568_p6 = por %p567_p5, %p566_p4 }
   0xf   :  { %p569_p7 = pnand %p568_p6, %p562_p3 }
  0x11   :  { %572 = shalt.err (!%p569_p7)
}
  0x12   :  { %s670_s11 = smov 64   ;;  %s671_s12 = smov 4  }
  0x13   :  { %39 = dma.hbm_to_vmem [thread:$0]  %s838_s1, 512, %s34_s25, [#allocation6], %s670_s11, %s670_s11, %s671_s12  }
  0x14   :  { %s672_s15 = smov [#allocation2]   ;;  %s573_s19 = scalar_lea.hbm %s837_s0, 256 }
  0x15   :  { %s21_s16 = sshll.u32 %s672_s15, 4  ;;  %p574_p8 = scmp.ne.s32.totalorder %s837_s0, %s573_s19  ;;  %s22_s16 = int_to_ptr.vmem [resolvable:$true] %s21_s16 }
  0x16   :  { %p577_p9 = scmp.lt.u32.totalorder %s573_s19, %s837_s0 }
  0x18   :  { %p579_p10 = pnand %p577_p9, %p574_p8 }
  0x1a   :  { %582 = shalt.err (!%p579_p10)
}
  0x1b   :  { %s583_s24 = scalar_lea.vmem %s22_s16, 256  ;;  %p588_p12 = scmp.lt.s32.totalorder %s22_s16, %s22_s16 }
  0x1c   :  { %p584_p11 = scmp.ne.s32.totalorder %s22_s16, %s583_s24  ;;  %p589_p13 = scmp.lt.s32.totalorder %s583_s24, %s583_s24 }
  0x1e   :  { %p590_p0 = por %p589_p13, %p588_p12 }
  0x20   :  { %p591_p1 = pnand %p590_p0, %p584_p11 }
  0x22   :  { %594 = shalt.err (!%p591_p1)
}
  0x23   :  { %s673_s1 = smov 128   ;;  %s674_s25 = smov 8  }
  0x24   :  { %27 = dma.hbm_to_vmem [thread:$0]  %s837_s0, 256, %s22_s16, [#allocation3], %s673_s1, %s673_s1, %s674_s25  }
  0x25   :  { %s675_s28 = smov [#allocation7]   ;;  %s676_s30 = smov [#allocation8]  }
  0x26   :  { %s47_s29 = sshll.u32 %s675_s28, 4  ;;  %s61_s8 = sshll.u32 %s676_s30, 4  ;;  %s48_s29 = int_to_ptr.vmem [resolvable:$true] %s47_s29  ;;  %s750_s8 = int_to_ptr.vmem [resolvable:$true] %s61_s8 }
  0x27   :  { %s595_s13 = scalar_lea.hbm %s840_s3, 1024 }
  0x28   :  { %p596_p2 = scmp.ne.s32.totalorder %s840_s3, %s595_s13  ;;  %p599_p3 = scmp.lt.u32.totalorder %s595_s13, %s840_s3 }
  0x2a   :  { %p601_p4 = pnand %p599_p3, %p596_p2 }
  0x2c   :  { %604 = shalt.err (!%p601_p4)
}
  0x2d   :  { %s605_s0 = scalar_lea.vmem %s48_s29, 1024  ;;  %p610_p6 = scmp.lt.s32.totalorder %s48_s29, %s48_s29 }
  0x2e   :  { %p606_p5 = scmp.ne.s32.totalorder %s48_s29, %s605_s0  ;;  %p611_p7 = scmp.lt.s32.totalorder %s605_s0, %s605_s0 }
  0x30   :  { %p612_p8 = por %p611_p7, %p610_p6 }
  0x32   :  { %p613_p9 = pnand %p612_p8, %p606_p5 }
  0x34   :  { %616 = shalt.err (!%p613_p9)
}
  0x35   :  { %53 = dma.hbm_to_vmem [thread:$0]  %s840_s3, 1024, %s48_s29, [#allocation6], %s670_s11, %s670_s11, %s671_s12  }
  0x36   :  { %s617_s22 = scalar_lea.hbm %s842_s5, 1024 }
  0x37   :  { %p618_p10 = scmp.ne.s32.totalorder %s842_s5, %s617_s22  ;;  %p621_p11 = scmp.lt.u32.totalorder %s617_s22, %s842_s5 }
  0x39   :  { %p623_p12 = pnand %p621_p11, %p618_p10 }
  0x3b   :  { %626 = shalt.err (!%p623_p12)
}
  0x3c   :  { %s627_s28 = scalar_lea.vmem %s750_s8, 1024  ;;  %p632_p0 = scmp.lt.s32.totalorder %s750_s8, %s750_s8 }
  0x3d   :  { %p628_p13 = scmp.ne.s32.totalorder %s750_s8, %s627_s28  ;;  %p633_p1 = scmp.lt.s32.totalorder %s627_s28, %s627_s28 }
  0x3f   :  { %p634_p2 = por %p633_p1, %p632_p0 }
  0x41   :  { %p635_p3 = pnand %p634_p2, %p628_p13 }
  0x43   :  { %638 = shalt.err (!%p635_p3)
}
  0x44   :  { %67 = dma.hbm_to_vmem [thread:$0]  %s842_s5, 1024, %s750_s8, [#allocation9], %s670_s11, %s670_s11, %s671_s12  }
  0x45   :  { %661 = dma.done.wait [#allocation3], 256  }
  0x46   :  { %662 = vsyncadd [#allocation3], 4294967040 }
  0x47   :  { %663 = dma.done.wait [#allocation6], 1536  }
  0x48   :  { %664 = vsyncadd [#allocation6], 4294965760 }
  0x49   :  { %665 = dma.done.wait [#allocation9], 1024  }
  0x4a   :  { %666 = vsyncadd [#allocation9], 4294966272  ;;  %v677_v0 = vmov 0.0   ;;  %vm678_vm0 = vmmov 0   ;;  %v531_v1 = vld [vmem:[#allocation5] sm:$0xff]   ;;  %v532_v2 = vld [vmem:[#allocation5 + $0x8] sm:$0xff]  }
  0x4b   :  { %468 = vmatprep.subr.bf16.mxu0 %v677_v0  ;;  %476 = vmatprep.mubr.msk.bf16.mxu0 %vm678_vm0, %v677_v0  ;;  %v535_v3 = vld [vmem:[#allocation7] sm:$0xff]   ;;  %v533_v4 = vld [vmem:[#allocation5 + $0x10] sm:$0xff]   ;;  %v536_v5 = vld [vmem:[#allocation7 + $0x8] sm:$0xff]   ;;  %vm125_vm1 = vcmask 523264   ;;  %s679_s9 = smov [#allocation10]  }
  0x4c   :  { %480 = vmatprep.subr.bf16.mxu1 %v677_v0  ;;  %496 = vmatprep.mubr.msk.bf16.mxu1 %vm678_vm0, %v677_v0  ;;  %v534_v6 = vld [vmem:[#allocation5 + $0x18] sm:$0xff]   ;;  %v83_v7 = vld [vmem:[#allocation2] sm:$0xff]  ;;  %v539_v12 = vld [vmem:[#allocation7 + $0x20] sm:$0xff]   ;;  %s407_s10 = sshll.u32 %s679_s9, 4  ;;  %s408_s10 = int_to_ptr.vmem [resolvable:$true] %s407_s10 }
  0x4d   :  { %469 = vmatpush3.bf16.msra.mxu0 %v531_v1  ;;  %481 = vmatpush3.bf16.msra.mxu1 %v535_v3  ;;  %v84_v8 = vld [vmem:[#allocation2 + $0x8] sm:$0xff]  ;;  %v537_v9 = vld [vmem:[#allocation7 + $0x10] sm:$0xff]   ;;  %v540_v13 = vld [vmem:[#allocation7 + $0x28] sm:$0xff]   ;;  %p644_p5 = scmp.lt.s32.totalorder %s408_s10, %s408_s10 }
  0x4e   :  { %470 = vmatprep.subr.bf16.mxu0 %v677_v0  ;;  %482 = vmatprep.subr.bf16.mxu1 %v677_v0  ;;  %v85_v10 = vpack.c.bf16 %v84_v8, %v83_v7  ;;  %v538_v11 = vld [vmem:[#allocation7 + $0x18] sm:$0xff]   ;;  %v541_v14 = vld [vmem:[#allocation7 + $0x30] sm:$0xff]   ;;  %v543_v16 = vld [vmem:[#allocation8] sm:$0xff]  }
  0x4f   :  { %v542_v15 = vld [vmem:[#allocation7 + $0x38] sm:$0xff]   ;;  %v544_v17 = vld [vmem:[#allocation8 + $0x8] sm:$0xff]   ;;  %v545_v18 = vld [vmem:[#allocation8 + $0x10] sm:$0xff]  }
  0x50   :  { %v546_v19 = vld [vmem:[#allocation8 + $0x18] sm:$0xff]   ;;  %v547_v20 = vld [vmem:[#allocation8 + $0x20] sm:$0xff]   ;;  %v548_v21 = vld [vmem:[#allocation8 + $0x28] sm:$0xff]  }
  0x51   :  { %471 = vmatpush3.bf16.msra.mxu0 %v532_v2  ;;  %483 = vmatpush3.bf16.msra.mxu1 %v536_v5  ;;  %v421_v22 = vld [vmem:[%s839_s2] ss:$0 sm:$0xff]  ;;  %v550_v33 = vld [vmem:[#allocation8 + $0x38] sm:$0xff]  }
  0x52   :  { %472 = vmatprep.subr.bf16.mxu0 %v677_v0  ;;  %484 = vmatprep.subr.bf16.mxu1 %v677_v0  ;;  %v549_v32 = vld [vmem:[#allocation8 + $0x30] sm:$0xff]  }
  0x53   :  { %v427_v34 = vld [vmem:[%s841_s4] ss:$0 sm:$0xff]  ;;  %s639_s4 = scalar_lea.vmem %s408_s10, 256 }
  0x54   :  { %v436_v44 = vld [vmem:[%s843_s6] ss:$0 sm:$0xff]  ;;  %p640_p4 = scmp.ne.s32.totalorder %s408_s10, %s639_s4  ;;  %p645_p6 = scmp.lt.s32.totalorder %s639_s4, %s639_s4 }
  0x55   :  { %473 = vmatpush3.bf16.msra.mxu0 %v533_v4  ;;  %485 = vmatpush3.bf16.msra.mxu1 %v537_v9 }
  0x56   :  { %474 = vmatprep.subr.bf16.mxu0 %v677_v0  ;;  %486 = vmatprep.subr.bf16.mxu1 %v677_v0  ;;  %p646_p7 = por %p645_p6, %p644_p5 }
  0x58   :  { %p647_p8 = pnand %p646_p7, %p640_p4 }
  0x59   :  { %475 = vmatpush3.bf16.msra.mxu0 %v534_v6  ;;  %487 = vmatpush3.bf16.msra.mxu1 %v538_v11 }
  0x5a   :  { %500 = vmatprep.subr.bf16.mxu0 %v677_v0  ;;  %488 = vmatprep.subr.bf16.mxu1 %v677_v0 }
  0x5c   :  { %477 = vmatmul.mubr.msk.bf16.vlgmr.msra.gmra.mrb[0].mxu0 %vm125_vm1, %v85_v10 }
  0x5d   :  { %516 = vmatprep.mubr.msk.bf16.mxu0 %vm678_vm0, %v677_v0  ;;  %489 = vmatpush3.bf16.msra.mxu1 %v539_v12 }
  0x5e   :  { %490 = vmatprep.subr.bf16.mxu1 %v677_v0  ;;  %501 = vmatpush3.bf16.msra.mxu0 %v543_v16 }
  0x5f   :  { %502 = vmatprep.subr.bf16.mxu0 %v677_v0 }
  0x61   :  { %491 = vmatpush3.bf16.msra.mxu1 %v540_v13 }
  0x62   :  { %492 = vmatprep.subr.bf16.mxu1 %v677_v0  ;;  %503 = vmatpush3.bf16.msra.mxu0 %v544_v17 }
  0x63   :  { %504 = vmatprep.subr.bf16.mxu0 %v677_v0 }
  0x65   :  { %493 = vmatpush3.bf16.msra.mxu1 %v541_v14 }
  0x66   :  { %494 = vmatprep.subr.bf16.mxu1 %v677_v0  ;;  %505 = vmatpush3.bf16.msra.mxu0 %v545_v18 }
  0x67   :  { %506 = vmatprep.subr.bf16.mxu0 %v677_v0 }
  0x69   :  { %495 = vmatpush3.bf16.msra.mxu1 %v542_v15 }
  0x6a   :  { %507 = vmatpush3.bf16.msra.mxu0 %v546_v19 }
  0x6b   :  { %508 = vmatprep.subr.bf16.mxu0 %v677_v0 }
  0x6e   :  { %509 = vmatpush3.bf16.msra.mxu0 %v547_v20 }
  0x6f   :  { %510 = vmatprep.subr.bf16.mxu0 %v677_v0 }
  0x72   :  { %511 = vmatpush3.bf16.msra.mxu0 %v548_v21 }
  0x73   :  { %512 = vmatprep.subr.bf16.mxu0 %v677_v0 }
  0x76   :  { %513 = vmatpush3.bf16.msra.mxu0 %v549_v32 }
  0x77   :  { %514 = vmatprep.subr.bf16.mxu0 %v677_v0 }
  0x7a   :  { %515 = vmatpush3.bf16.msra.mxu0 %v550_v33 }
 0x12f   :  { %v163_v23 = vpop.f32.mrb[0].mxu0 }
 0x130   :  { %v164_v24 = vadd.f32 %v421_v22, %v163_v23  ;;  %v478_v25 = vpop.f32.mrb[1].mxu0 }
 0x131   :  { %v166_v26 = vpop.f32.mrb[2].mxu0 }
 0x132   :  { %v167_v27 = vadd.f32 %v421_v22, %v166_v26  ;;  %v479_v28 = vpop.f32.mrb[3].mxu0  ;;  %v170_v29 = vmax.f32 %v164_v24, 0.0 }
 0x134   :  { %v171_v30 = vmax.f32 %v167_v27, 0.0 }
 0x136   :  { %v172_v31 = vpack.c.bf16 %v171_v30, %v170_v29 }
 0x138   :  { %497 = vmatmul.mubr.bf16.vlgmr.msra.gmra.mrb[0].mxu1 %v172_v31 }
 0x20b   :  { %v278_v35 = vpop.f32.mrb[0].mxu1 }
 0x20c   :  { %v279_v36 = vadd.f32 %v427_v34, %v278_v35  ;;  %v498_v37 = vpop.f32.mrb[1].mxu1 }
 0x20d   :  { %v281_v38 = vpop.f32.mrb[2].mxu1 }
 0x20e   :  { %v282_v39 = vadd.f32 %v427_v34, %v281_v38  ;;  %v499_v40 = vpop.f32.mrb[3].mxu1  ;;  %v285_v41 = vmax.f32 %v279_v36, 0.0 }
 0x210   :  { %v286_v42 = vmax.f32 %v282_v39, 0.0 }
 0x212   :  { %v287_v43 = vpack.c.bf16 %v286_v42, %v285_v41 }
 0x214   :  { %517 = vmatmul.mubr.bf16.vlgmr.msra.gmra.mrb[4].mxu0 %v287_v43 }
 0x2e7   :  { %v393_v45 = vpop.f32.mrb[4].mxu0 }
 0x2e8   :  { %v394_v46 = vadd.f32 %v436_v44, %v393_v45  ;;  %v518_v47 = vpop.f32.mrb[5].mxu0 }
 0x2e9   :  { %v396_v48 = vpop.f32.mrb[6].mxu0 }
 0x2ea   :  { %400 = vst [vmem:[#allocation10] sm:$0xff] %v394_v46  ;;  %v397_v49 = vadd.f32 %v436_v44, %v396_v48  ;;  %v519_v50 = vpop.f32.mrb[7].mxu0 }
 0x2ec   :  { %401 = vst [vmem:[#allocation10 + $0x8] sm:$0xff] %v397_v49 }
 0x2ed   :  { %650 = shalt.err (!%p647_p8)
}
 0x2ee   :  { %s651_s14 = scalar_lea.hbm %s844_s7, 256 }
 0x2ef   :  { %p652_p9 = scmp.ne.s32.totalorder %s844_s7, %s651_s14  ;;  %p655_p10 = scmp.lt.u32.totalorder %s651_s14, %s844_s7 }
 0x2f1   :  { %p657_p11 = pnand %p655_p10, %p652_p9 }
 0x2f3   :  { %660 = shalt.err (!%p657_p11)
}
 0x2f4   :  { %413 = dma.vmem_to_hbm [thread:$0]  %s408_s10, 256, %s844_s7, [#allocation4], %s673_s1, %s673_s1, %s674_s25  }
 0x2f5   :  { %667 = dma.done.wait [#allocation4], 256  }
 0x2f6   :  { %668 = vsyncadd [#allocation4], 4294967040 }
 0x2f7   :  { %417 = vsyncpa [#allocation3], 1 }
 0x2f8   :  { %418 = vsyncpa [#allocation6], 1 }
 0x2f9   :  { %419 = vsyncpa [#allocation9], 1 }
 0x2fa   :  { %420 = vsyncpa [#allocation4], 1 }

</bundles_post_ra>
